<compile_context>
chip_gen: v7x
topology: tpu7x:2x2x1
jax: 0.10.0
libtpu: 0.0.40
codegen_flags: <defaults>
</compile_context>

<pallas_src>
import functools

import jax
import jax.numpy as jnp
from jax import lax
from jax.experimental import pallas as pl
from jax.experimental.pallas import tpu as pltpu

EPS = 1e-5


# ---------------------------------------------------------------------------
# Kernels
# ---------------------------------------------------------------------------
def _stats_kernel(x_ref, o_ref):
    """Per-(n, l-tile) partial sum and sum-of-squares over the lane axis."""
    x = x_ref[0]                                           # (C, Lt)
    s = jnp.sum(x, axis=1, keepdims=True)                  # (C, 1)
    ss = jnp.sum(x * x, axis=1, keepdims=True)             # (C, 1)
    o_ref[0, 0] = jnp.concatenate([s, ss], axis=1)         # (C, 2)


def _bn_relu_conv(win, p, w2d, *, w, lt, pad, length, pid_l):
    """win: (C_in, lt + 2*pad) padded-input window for this tile.
    p: (C, 3) packed [bn_scale, bn_shift, conv_bias]; w2d: (C_out, w*C_in).
    Returns the conv output tile (C_out, lt) in f32."""
    act = jnp.maximum(win * p[:, 0:1] + p[:, 1:2], 0.0)    # fused BN + ReLU
    # Zero the global zero-padding positions (BN+ReLU of 0 is generally nonzero).
    gpos = pid_l * lt + lax.broadcasted_iota(jnp.int32, act.shape, 1)
    act = jnp.where((gpos >= pad) & (gpos < length + pad), act, 0.0)
    if w == 1:
        lhs = act
    else:
        # im2col: stack the w tap-shifted views -> one MXU matmul with K = w*C_in.
        lhs = jnp.concatenate([act[:, k:k + lt] for k in range(w)], axis=0)
    y = jnp.dot(w2d, lhs, preferred_element_type=jnp.float32)   # (C_out, lt)
    return y + p[:, 2:3]


def _conv1_kernel(w, lt, pad, length, halo, *refs):
    """BN1 + ReLU + Conv1; also emits per-tile partial stats of conv1 (for BN2)."""
    if halo:
        cur_ref, nxt_ref, p_ref, w2d_ref, y_ref, st_ref = refs
        win = jnp.concatenate([cur_ref[0], nxt_ref[0, :, 0:2 * pad]], axis=1)
    else:
        cur_ref, p_ref, w2d_ref, y_ref, st_ref = refs
        win = cur_ref[0]                                   # full padded row
    y = _bn_relu_conv(win, p_ref[...], w2d_ref[...],
                      w=w, lt=lt, pad=pad, length=length, pid_l=pl.program_id(1))
    y_ref[0] = y.astype(y_ref.dtype)
    st_ref[0, 0] = jnp.concatenate(
        [jnp.sum(y, axis=1, keepdims=True), jnp.sum(y * y, axis=1, keepdims=True)],
        axis=1)


def _conv2_kernel(w, lt, pad, length, halo, *refs):
    """BN2 + ReLU + Conv2 + residual add."""
    if halo:
        cur_ref, nxt_ref, x_ref, p_ref, w2d_ref, o_ref = refs
        win = jnp.concatenate([cur_ref[0], nxt_ref[0, :, 0:2 * pad]], axis=1)
    else:
        cur_ref, x_ref, p_ref, w2d_ref, o_ref = refs
        win = cur_ref[0]
    y = _bn_relu_conv(win, p_ref[...], w2d_ref[...],
                      w=w, lt=lt, pad=pad, length=length, pid_l=pl.program_id(1))
    o_ref[0] = (y + x_ref[0]).astype(o_ref.dtype)


# ---------------------------------------------------------------------------
# Wrapper
# ---------------------------------------------------------------------------
def _fold_bn(sums, gamma, beta, count):
    """sums: (C, 2) [sum, sum_sq].  BN(v) = v*scale + shift (training-mode, biased var)."""
    mean = sums[:, 0] / count
    var = jnp.maximum(sums[:, 1] / count - mean * mean, 0.0)
    inv = lax.rsqrt(var + EPS)
    scale = gamma * inv
    shift = beta - mean * scale
    return scale, shift


def _pick_l_tile(length):
    """Largest lane-aligned tile that divides L (big tiles amortize per-step overhead)."""
    if length % 128 == 0:
        for t in (2048, 1024, 512, 256, 128):
            if length % t == 0:
                return t
    return length


def _window_specs(arr_pad, c, lt, halo, lb):
    """BlockSpecs (and matching call args) for the conv-input halo window."""
    if lb == 1:
        lp = arr_pad.shape[-1]
        return [pl.BlockSpec((1, c, lp), lambda i, j: (i, 0, 0))], [arr_pad]
    cur = pl.BlockSpec((1, c, lt), lambda i, j: (i, 0, j))
    if not halo:                                           # pad == 0
        return [cur], [arr_pad]
    nxt = pl.BlockSpec((1, c, lt), lambda i, j: (i, 0, j + 1))
    return [cur, nxt], [arr_pad, arr_pad]


def residual_unit(x_ncl, params, w, l_tile=None):
    """x_ncl: (N, C, L) float32, PyTorch Conv1d layout."""
    assert w % 2 == 1, "'same' padding (w-1)//2 is only correct for odd w"
    g1, be1, g2, be2, w1, b1, w2, b2 = params
    n, c, length = x_ncl.shape
    pad = (w - 1) // 2

    lt = _pick_l_tile(length) if l_tile is None else l_tile
    assert length % lt == 0 and (lt % 128 == 0 or lt == length)
    lb = length // lt
    halo = (lb > 1) and (pad > 0)
    if halo:
        assert lt >= 2 * pad
    count = float(n * length)

    # PyTorch Conv1d weight (C_out, C_in, w) -> (C_out, w*C_in), rows ordered k*C_in + ci
    # to match the im2col LHS built in the kernel.
    w1_2d = jnp.transpose(w1, (0, 2, 1)).reshape(c, w * c)
    w2_2d = jnp.transpose(w2, (0, 2, 1)).reshape(c, w * c)

    # Pad the conv input once in HBM.  With a tiled L axis, pad the right side up to a
    # full extra tile so every halo block is a full (never partial) block.
    rpad = (lt - pad) if halo else pad
    x_pad = jnp.pad(x_ncl, ((0, 0), (0, 0), (pad, rpad)))

    parallel2 = pltpu.CompilerParams(dimension_semantics=("parallel", "parallel"))
    p_spec = pl.BlockSpec((c, 3), lambda i, j: (0, 0))
    w_spec = pl.BlockSpec((c, w * c), lambda i, j: (0, 0))
    tile_spec = pl.BlockSpec((1, c, lt), lambda i, j: (i, 0, j))
    st_spec = pl.BlockSpec((1, 1, c, 2), lambda i, j: (i, j, 0, 0))

    # ---- pass 1: global BN1 statistics of x (partial sums per tile) ----------------
    st1 = pl.pallas_call(
        _stats_kernel,
        out_shape=jax.ShapeDtypeStruct((n, lb, c, 2), jnp.float32),
        grid=(n, lb),
        in_specs=[tile_spec],
        out_specs=st_spec,
        compiler_params=parallel2,
    )(x_ncl)
    scale1, shift1 = _fold_bn(jnp.sum(st1, axis=(0, 1)), g1, be1, count)
    p1 = jnp.stack([scale1, shift1, b1], axis=1)           # packed (C, 3)

    # ---- pass 2: BN1 + ReLU + Conv1 (+ partial stats of conv1 for BN2) --------------
    win_specs, win_args = _window_specs(x_pad, c, lt, halo, lb)
    conv1, st2 = pl.pallas_call(
        functools.partial(_conv1_kernel, w, lt, pad, length, halo),
        out_shape=(jax.ShapeDtypeStruct((n, c, length), x_ncl.dtype),
                   jax.ShapeDtypeStruct((n, lb, c, 2), jnp.float32)),
        grid=(n, lb),
        in_specs=win_specs + [p_spec, w_spec],
        out_specs=(tile_spec, st_spec),
        compiler_params=parallel2,
    )(*win_args, p1, w1_2d)
    scale2, shift2 = _fold_bn(jnp.sum(st2, axis=(0, 1)), g2, be2, count)
    p2 = jnp.stack([scale2, shift2, b2], axis=1)

    # ---- pass 3: BN2 + ReLU + Conv2 + residual add -----------------------------------
    conv1_pad = jnp.pad(conv1, ((0, 0), (0, 0), (pad, rpad)))
    win_specs2, win_args2 = _window_specs(conv1_pad, c, lt, halo, lb)
    out = pl.pallas_call(
        functools.partial(_conv2_kernel, w, lt, pad, length, halo),
        out_shape=jax.ShapeDtypeStruct((n, c, length), x_ncl.dtype),
        grid=(n, lb),
        in_specs=win_specs2 + [tile_spec, p_spec, w_spec],
        out_specs=tile_spec,
        compiler_params=parallel2,
    )(*win_args2, x_ncl, p2, w2_2d)
    return out


# ---------------------------------------------------------------------------
# Pure-JAX reference (PyTorch training-mode forward)
# ---------------------------------------------------------------------------
def reference(x_ncl, params, w):
    g1, be1, g2, be2, w1, b1, w2, b2 = params
    pad = (w - 1) // 2

    def bn_relu(x, g, b):
        mean = x.mean(axis=(0, 2), keepdims=True)
        var = ((x - mean) ** 2).mean(axis=(0, 2), keepdims=True)
        y = (x - mean) / jnp.sqrt(var + EPS) * g[None, :, None] + b[None, :, None]
        return jnp.maximum(y, 0.0)

    def conv(x, wt, b):
        y = lax.conv_general_dilated(x, wt, (1,), [(pad, pad)],
                                     dimension_numbers=("NCW", "OIW", "NCW"))
        return y + b[None, :, None]

    act1 = bn_relu(x_ncl, g1, be1)
    c1 = conv(act1, w1, b1)
    act2 = bn_relu(c1, g2, be2)
    c2 = conv(act2, w2, b2)
    return c2 + x_ncl


if __name__ == "__main__":
    # ResidualUnit(l1=l2=8, w=5); x is (N, C, L) in PyTorch NCL layout.
    N, C, L, W = 2, 8, 256, 5

    key = jax.random.PRNGKey(0)
    ks = jax.random.split(key, 9)
    x = jax.random.normal(ks[0], (N, C, L), dtype=jnp.float32)

    gamma1 = 1.0 + 0.1 * jax.random.normal(ks[1], (C,), dtype=jnp.float32)
    beta1 = 0.1 * jax.random.normal(ks[2], (C,), dtype=jnp.float32)
    gamma2 = 1.0 + 0.1 * jax.random.normal(ks[3], (C,), dtype=jnp.float32)
    beta2 = 0.1 * jax.random.normal(ks[4], (C,), dtype=jnp.float32)
    conv1_w = 0.1 * jax.random.normal(ks[5], (C, C, W), dtype=jnp.float32)
    conv1_b = 0.1 * jax.random.normal(ks[6], (C,), dtype=jnp.float32)
    conv2_w = 0.1 * jax.random.normal(ks[7], (C, C, W), dtype=jnp.float32)
    conv2_b = 0.1 * jax.random.normal(ks[8], (C,), dtype=jnp.float32)
    params = (gamma1, beta1, gamma2, beta2, conv1_w, conv1_b, conv2_w, conv2_b)

    # Tiled path: force L tile = 128 -> grid (N, 2); exercises the halo exchange,
    # boundary masks and the partial-stats reduction across tiles.
    out = jax.block_until_ready(residual_unit(x, params, W, l_tile=128))
    ref = reference(x, params, W)
    assert out.shape == x.shape
    assert jnp.allclose(out, ref, atol=2e-4, rtol=2e-4), (
        f"max abs err {jnp.max(jnp.abs(out - ref))}")

    # Small-L fallback path (single block per row), as in the original toy shape.
    xs = jax.random.normal(ks[0], (N, C, 16), dtype=jnp.float32)
    outs = jax.block_until_ready(residual_unit(xs, params, W))
    refs_ = reference(xs, params, W)
    assert jnp.allclose(outs, refs_, atol=2e-4, rtol=2e-4), (
        f"max abs err {jnp.max(jnp.abs(outs - refs_))}")

    print("KERNEL_OK")
</pallas_src>

<mosaic_0001>
module attributes {stable_mosaic.version = 11 : i64} {
  func.func @_stats_kernel(%arg0: i32, %arg1: i32, %arg2: memref<1x8x128xf32, #tpu.memory_space<vmem>>, %arg3: memref<1x1x8x2xf32, #tpu.memory_space<vmem>>) attributes {dimension_semantics = [#tpu.dimension_semantics<parallel>, #tpu.dimension_semantics<parallel>], iteration_bounds = array<i64: 2, 2>, scalar_prefetch = 0 : i64, scratch_operands = 0 : i64, tpu.core_type = #tpu.core_type<tc>, window_params = [{transform_indices = @transform_0, window_bounds = array<i64: 1, 8, 128>}, {transform_indices = @transform_1, window_bounds = array<i64: 1, 1, 8, 2>}]} {
    %c0 = arith.constant 0 : index
    %c0_0 = arith.constant 0 : index
    %c0_1 = arith.constant 0 : index
    %0 = vector.load %arg2[%c0, %c0_0, %c0_1] : memref<1x8x128xf32, #tpu.memory_space<vmem>>, vector<1x8x128xf32>
    %1 = vector.shape_cast %0 : vector<1x8x128xf32> to vector<8x128xf32>
    %cst = arith.constant dense<0.000000e+00> : vector<8xf32>
    %2 = vector.multi_reduction <add>, %1, %cst [1] : vector<8x128xf32> to vector<8xf32>
    %3 = vector.shape_cast %2 : vector<8xf32> to vector<8x1xf32>
    %4 = arith.mulf %1, %1 : vector<8x128xf32>
    %cst_2 = arith.constant dense<0.000000e+00> : vector<8xf32>
    %5 = vector.multi_reduction <add>, %4, %cst_2 [1] : vector<8x128xf32> to vector<8xf32>
    %6 = vector.shape_cast %5 : vector<8xf32> to vector<8x1xf32>
    %7 = tpu.concatenate %3, %6 in 1 : vector<8x1xf32>, vector<8x1xf32> -> vector<8x2xf32>
    %c0_3 = arith.constant 0 : index
    %c0_4 = arith.constant 0 : index
    %c0_5 = arith.constant 0 : index
    %c0_6 = arith.constant 0 : index
    %8 = vector.load %arg3[%c0_3, %c0_4, %c0_5, %c0_6] : memref<1x1x8x2xf32, #tpu.memory_space<vmem>>, vector<1x1x8x2xf32>
    %9 = vector.shape_cast %8 : vector<1x1x8x2xf32> to vector<8x2xf32>
    %10 = vector.shape_cast %7 : vector<8x2xf32> to vector<1x1x8x2xf32>
    tpu.vector_store %arg3[%c0_3, %c0_4, %c0_5, %c0_6], %10 {strides = array<i32>} : memref<1x1x8x2xf32, #tpu.memory_space<vmem>>, vector<1x1x8x2xf32>,
    return
  }
  func.func @transform_0(%arg0: i32, %arg1: i32) -> (i32, i32, i32) {
    %c0_i32 = arith.constant 0 : i32
    %c0_i32_0 = arith.constant 0 : i32
    return %arg0, %c0_i32, %arg1 : i32, i32, i32
  }
  func.func @transform_1(%arg0: i32, %arg1: i32) -> (i32, i32, i32, i32) {
    %c0_i32 = arith.constant 0 : i32
    %c0_i32_0 = arith.constant 0 : i32
    %c0_i32_1 = arith.constant 0 : i32
    return %arg0, %arg1, %c0_i32, %c0_i32_0 : i32, i32, i32, i32
  }
}

</mosaic_0001>

<bundles_post_ra>
// kernel: tpu_custom_call.1
= control target key start
LH: loop header
LB: loop body
LE: loop exit
PB: predicated region body
PF: predicated region fallthrough
CT: control target
= control target key end

     0   :  { %6 = vsyncpa [#allocation3], 0  ;;  %s607_s0 = inlined_call_operand.hbm [shape: f32[2,8,256], index: 0, kind: input, shape index: {}]   ;;  %s608_s1 = inlined_call_operand.vmem [shape: f32[2,2,8,2], index: 1, kind: output, shape index: {}]  }
   0x1   :  { %8 = vsyncpa [#allocation3 + $0x1], 0  ;;  %s455_s6 = smov 0   ;;  %s457_s7 = smov 0  }
   0x2   :  { %s459_s8 = smov 0   ;;  %s461_s9 = smov 0  }
   0x3   :  { %s463_s10 = smov 0   ;;  %s465_s11 = smov 0  }
   0x4   :  { %s467_s12 = smov 0   ;;  %s469_s13 = smov 0  }
   0x5 LB: > { %s262_s14 = sadd.s32 4294967295, %s442_s13   ;;  %s23_s15 = sadd.s32 1, %s434_s11  ;;  %s442_s13 = sphi %s469_s13, %s14_s13   ;;  %s438_s12 = sphi %s467_s12, %s620_s12   ;;  %s434_s11 = sphi %s465_s11, %s619_s11   ;;  %s430_s10 = sphi %s463_s10, %s618_s10   ;;  %s426_s9 = sphi %s461_s9, %s617_s9   ;;  %s422_s8 = sphi %s459_s8, %s616_s8   ;;  %s418_s7 = sphi %s457_s7, %s615_s7   ;;  %s414_s6 = sphi %s455_s6, %s614_s6  }
   0x6   : > { %p24_p0 = scmp.ge.s32.totalorder %s23_s15, 2  ;;  %s26_s16 = sadd.s32 1, %s438_s12 }
   0x7   : > { %s35_s17 = sadd.s32 1, %s422_s8  ;;  %p42_p1 = scmp.ne.s32.totalorder %s422_s8, %s418_s7 }
   0x8   : > { %s622_s15 = smov (%p24_p0, %s23_s15), 0  ;;  %s624_s16 = smov (!%p24_p0, %s26_s16), %s438_s12 }
   0x9   : > { %s31_s18 = ssub.s32 %s434_s11, %s622_s15  ;;  %p43_p2 = scmp.eq.s32.totalorder %s442_s13, 0 }
   0xa   : > { %p28_p3 = scmp.ge.s32.totalorder %s624_s16, 2  ;;  %p48_p4 = scmp.ne.s32.totalorder %s418_s7, %s414_s6 }
   0xb   : > { %p506_p5 = por %p43_p2, %p42_p1  ;;  %p49_p6 = scmp.eq.s32.totalorder %s262_s14, 0 }
   0xc   : > { %s626_s16 = smov (%p28_p3, %s624_s16), 0  ;;  %p281_p8 = scmp.lt.s32.totalorder %s442_s13, 4 }
   0xd   : > { %p512_p7 = por %p49_p6, %p48_p4  ;;  %s30_s21 = ssub.s32 %s438_s12, %s626_s16 }
   0xe   : > { %s32_s22 = sor.u32 %s31_s18, %s30_s21  ;;  %s100_s23 = sand.u32 1, %s422_s8  }
   0xf   : > { %p33_p9 = scmp.eq.s32.totalorder %s32_s22, 0  ;;  %s266_s24 = sshll.u32 %s100_s23, 3 }
  0x10   : > { %s267_s25 = sshll.u32 %s438_s12, 1  ;;  %s104_s29 = scalar_lea.vmem [#allocation2], %s266_s24 }
  0x11   : > { %s522_s26 = scalar_select %p33_p9, %s422_s8, %s35_s17  }
  0x12   : > { %s109_s27 = sadd.s32 %s434_s11, %s267_s25  ;;  %s113_s30 = sshll.u32 %s104_s29, 4  ;;  %s530_s30 = int_to_ptr.vmem [resolvable:$true] %s113_s30 }
  0x13   : > { %s268_s28 = sshll.u32 %s109_s27, 7  ;;  %p536_p10 = pnand %p281_p8, %p506_p5 }
  0x14   : > { %s528_s4 = scalar_lea.hbm %s607_s0, %s268_s28  ;;  %s101_s6 = scalar_lea.sflag [#allocation3], %s100_s23 }
  0x15   : > { %s346_s14 = scalar_lea.hbm %s528_s4, 128  ;;  %p348_p0 = pneg %p536_p10 }
  0x16   : > { %p347_p13 = scmp.ne.s32.totalorder %s528_s4, %s346_s14  ;;  %s351_s19 = scalar_lea.hbm %s607_s0, 512 }
  0x17   : > { %p352_p3 = scmp.lt.u32.totalorder %s528_s4, %s607_s0  ;;  %p353_p4 = scmp.lt.u32.totalorder %s351_s19, %s346_s14 }
  0x18   : > { %p349_p1 = pnand %p348_p0, %p347_p13  ;;  %p355_p6 = scmp.lt.u32.totalorder %s346_s14, %s528_s4 }
  0x19   : > { %p354_p5 = por %p353_p4, %p352_p3 }
  0x1a   : > { %p350_p2 = pneg %p349_p1 }
  0x1b   : > { %p356_p8 = por %p355_p6, %p354_p5 }
  0x1d   : > { %p357_p9 = pnand %p356_p8, %p350_p2 }
  0x1f   : > { %360 = shalt.err (!%p357_p9)
}
  0x20   : > { %s361_s23 = scalar_lea.vmem %s530_s30, 128  ;;  %s444_s24 = smov [#allocation2]  }
  0x21   : > { %p362_p13 = scmp.ne.s32.totalorder %s530_s30, %s361_s23  ;;  %s366_s25 = sshll.u32 %s444_s24, 4  ;;  %s367_s25 = int_to_ptr.vmem [resolvable:$false] %s366_s25 }
  0x22   : > { %s368_s27 = scalar_lea.vmem %s367_s25, 256  ;;  %p369_p12 = scmp.lt.s32.totalorder %s530_s30, %s367_s25 }
  0x23   : > { %p364_p1 = pnand %p362_p13, %p348_p0  ;;  %p370_p3 = scmp.lt.s32.totalorder %s368_s27, %s361_s23 }
  0x25   : > { %p365_p11 = pneg %p364_p1  ;;  %p371_p4 = por %p370_p3, %p369_p12 }
  0x27   : > { %p372_p5 = pnand %p371_p4, %p365_p11 }
  0x29   : > { %375 = shalt.err (!%p372_p5)
}
  0x2a   : > { %280 = dma.hbm_to_vmem [thread:$0]  (!%p536_p10), %s528_s4, 128, %s530_s30, %s101_s6  }
  0x2b   : > { %p612_p2 = scmp.lt.s32.totalorder %s442_s13, 5  ;;  %p613_p6 = scmp.ge.s32.totalorder %s442_s13, 1 }
  0x2d   : > { %p119_p0 = pnand %p613_p6, %p612_p2 }
  0x2e   : > { %s124_s28 = sand.u32 (!%p119_p0), 1, %s418_s7  }
  0x2f   : > { %122 = sbr.rel (%p119_p0) target bundleno = 204 (0xcc), region = 24  ;;  %s270_s29 = sshll.u32 (!%p119_p0), %s124_s28, 3 }
  0x30   : > { %s125_s2 = scalar_lea.sflag (!%p119_p0), [#allocation3], %s124_s28  ;;  %s128_s3 = scalar_lea.vmem (!%p119_p0), [#allocation2], %s270_s29 }
  0x36   : > { %409 = dma.done.wait (%p512_p7), %s125_s2, 128  }
  0x37   : > { %411 = vsyncadd (%p512_p7), %s125_s2, 4294967168  ;;  %v158_v0 = vld [vmem:[%s128_s3] sm:$0xff]  ;;  %p150_p10 = scmp.lt.s32.totalorder %s430_s10, 1  ;;  %p152_p11 = scmp.lt.s32.totalorder %s426_s9, 1  ;;  %vm164_vm0 = vcmask 7168   ;;  %vm166_vm1 = vcmask 15360  }
  0x38   : > { %159 = vadd.xlane.f32.xlu0 %v158_v0  ;;  %v161_v1 = vmul.f32 %v158_v0, %v158_v0 }
  0x39   : > { %s628_s10 = smov (!%p150_p10, %s430_s10), 1  ;;  %s630_s9 = smov (!%p152_p11, %s426_s9), 1 }
  0x3a   : > { %s271_s30 = sshll.u32 %s628_s10, 1 }
  0x3b   : > { %s155_s4 = sadd.s32 %s271_s30, %s630_s9 }
  0x3c   : > { %162 = vadd.xlane.f32.xlu0 %v161_v1  ;;  %s272_s5 = sshll.u32 %s155_s4, 3 }
  0x3d   : > { %s157_s14 = scalar_lea.vmem %s608_s1, %s272_s5 }
  0xc5   : > { %v160_v2 = vpop.xlane.xlu0 %159 }
  0xc9   : > { %v163_v3 = vpop.xlane.xlu0 %162 }
  0xca   : > { %v165_v4 = vsel %vm164_vm0, %v160_v2, %v163_v3 }
  0xcb   : > { %167 = vst.msk [vmem:[%s157_s14] sm:$0xff] %vm166_vm1, %v165_v4 }
  0xcc PF: > { %s14_s13 = sadd.s32 1, %s442_s13   ;;  %s614_s6 = smov %s418_s7 }
  0xcd   : > { %p11_p7 = scmp.ge.s32.totalorder %s14_s13, 6   ;;  %s615_s7 = smov %s422_s8 }
  0xce   : > { %s616_s8 = smov %s522_s26  ;;  %s617_s9 = smov %s434_s11 }
  0xcf   : > { %s618_s10 = smov %s438_s12  ;;  %s619_s11 = smov %s622_s15 }
  0xd0   : > { %s620_s12 = smov %s626_s16  ;;  %13 = sbr.rel (!%p11_p7) target bundleno = 5 (0x5), region = 64 }
  0xd7   :  { %195 = vsyncpa [#allocation3], 1 }
  0xd8   :  { %197 = vsyncpa [#allocation3 + $0x1], 1 }

</bundles_post_ra>
